<compile_context>
chip_gen: v7x
topology: tpu7x:2x2x1
jax: 0.10.0
libtpu: 0.0.40
codegen_flags: <defaults>
</compile_context>

<pallas_src>
import numpy as np
import jax
import jax.numpy as jnp
from jax import lax
from jax.experimental import pallas as pl
from jax.experimental.pallas import tpu as pltpu


def _round_up(v, m):
    return ((v + m - 1) // m) * m


def make_lnn_kernel(nr, na, out_width):
    qd = nr + 2 * na              # generalized-coordinate dim (r, cos th, sin th)
    dq = nr + na                  # velocity dim
    used = qd + dq + dq * dq      # packed payload width: head | rhs | Hdq(flat)
    f32 = jnp.float32
    dn_ll = (((1,), (1,)), ((), ()))   # contract last dim of both operands

    def kernel(x_ref, w1_ref, w1ct_ref, w2_ref, w3_ref, b1_ref, b2_ref,
               eye_ref, out_ref):
        x = x_ref[...]            # (B, D)
        W1 = w1_ref[...]          # (H1, D)
        W1cT = w1ct_ref[...]      # (dq, H1)  rows = columns qd: of W1
        W2 = w2_ref[...]          # (H2, H1)
        w3 = w3_ref[...]          # (1, H2)
        b1 = b1_ref[...]          # (1, H1)
        b2 = b2_ref[...]          # (1, H2)
        eye_eps = eye_ref[...]    # (dq, dq) = eps * I

        B = x.shape[0]

        # ---- MLP forward + analytic input-gradient of the scalar Lagrangian
        z1 = lax.dot_general(x, W1, dn_ll, preferred_element_type=f32) + b1
        h1 = jnp.tanh(z1)
        s1 = 1.0 - h1 * h1
        z2 = lax.dot_general(h1, W2, dn_ll, preferred_element_type=f32) + b2
        h2 = jnp.tanh(z2)
        s2 = 1.0 - h2 * h2
        v2 = s2 * w3                                               # dL/dz2 (B,H2)
        u1 = jnp.dot(v2, W2, preferred_element_type=f32)           # dL/dh1 (B,H1)
        v1 = s1 * u1                                               # dL/dz1 (B,H1)
        grad = jnp.dot(v1, W1, preferred_element_type=f32)         # dL/dx  (B,D)
        d1 = -2.0 * h1 * v1
        d2 = -2.0 * h2 * v2

        # ---- batched elementwise pieces (kept in registers, no scratch)
        x1 = x[:, nr:nr + na]
        x2 = x[:, nr + na:qd]
        dr = x[:, qd:qd + nr]
        dth = x[:, qd + nr:qd + nr + na]

        head = jnp.concatenate([dr, -x2 * dth, x1 * dth], axis=1)          # (B,qd)
        dLdth = -x2 * grad[:, nr:nr + na] + x1 * grad[:, nr + na:qd]
        dLdrdth = jnp.concatenate([grad[:, :nr], dLdth], axis=1)           # (B,dq)

        # ---- Hessian rows for the velocity coordinates, batched over samples
        hdq_cols = []
        rhs_cols = []
        for i in range(dq):               # dq is tiny & fixed by the architecture
            w1c_i = W1cT[i:i + 1, :]                                       # (1,H1)
            a_i = d1 * w1c_i                                               # (B,H1)
            g_i = s1 * w1c_i                                               # (B,H1)
            bc_i = lax.dot_general(g_i, W2, dn_ll,
                                   preferred_element_type=f32)             # (B,H2)
            e_i = jnp.dot(bc_i * d2, W2, preferred_element_type=f32) * s1  # (B,H1)
            hs_i = jnp.dot(a_i + e_i, W1, preferred_element_type=f32)      # (B,D)
            # Hdq row i (+ eps on the diagonal)
            hdq_cols.append(hs_i[:, qd:] + eye_eps[i:i + 1, :])            # (B,dq)
            # dq_term_i = sum_j Jrth[:, i, j] * dq_j  ==  sum_j Hs_i[:, :qd]*head
            dq_term_i = jnp.sum(hs_i[:, :qd] * head, axis=1, keepdims=True)
            rhs_cols.append(dLdrdth[:, i:i + 1] - dq_term_i)               # (B,1)

        rhs = jnp.concatenate(rhs_cols, axis=1)          # (B, dq)
        hdq_flat = jnp.concatenate(hdq_cols, axis=1)     # (B, dq*dq), row-major

        # ---- single lane-dense packed store: [head | rhs | Hdq_flat | 0-pad]
        pieces = [head, rhs, hdq_flat]
        if out_width > used:
            pieces.append(jnp.zeros((B, out_width - used), f32))
        out_ref[...] = jnp.concatenate(pieces, axis=1)

    return kernel


def lnn_pallas_parts(x, params, nr, na, eps=1e-6):
    """Runs the Pallas kernel: returns (head, Hdq_L, rhs) of the LNN forward."""
    W1, b1, W2, b2, w3, b3 = params        # b3 does not affect grad / Hessian
    bs, D = x.shape
    qd = nr + 2 * na
    dq = nr + na
    H1 = W1.shape[0]
    H2 = W2.shape[0]
    assert D == qd + dq

    used = qd + dq + dq * dq
    out_w = max(128, _round_up(used, 128))      # lane-dense packed output slab
    bs_pad = max(8, _round_up(bs, 8))           # fill sublanes

    x32 = x.astype(jnp.float32)
    if bs_pad != bs:
        x32 = jnp.pad(x32, ((0, bs_pad - bs), (0, 0)))

    # Tiny helpers computed once by XLA outside the kernel.
    W1cT = jnp.transpose(W1[:, qd:]).astype(jnp.float32)       # (dq, H1)
    eye_eps = (eps * jnp.eye(dq)).astype(jnp.float32)          # (dq, dq)

    vmem = lambda: pl.BlockSpec(memory_space=pltpu.MemorySpace.VMEM)
    packed = pl.pallas_call(
        make_lnn_kernel(nr, na, out_w),
        out_shape=jax.ShapeDtypeStruct((bs_pad, out_w), jnp.float32),
        in_specs=[vmem() for _ in range(8)],
        out_specs=vmem(),
    )(x32,
      W1.astype(jnp.float32), W1cT, W2.astype(jnp.float32),
      w3.reshape(1, H2).astype(jnp.float32),
      b1.reshape(1, H1).astype(jnp.float32),
      b2.reshape(1, H2).astype(jnp.float32),
      eye_eps)

    packed = packed[:bs]
    head = packed[:, :qd]
    rhs = packed[:, qd:qd + dq]
    Hdq = packed[:, qd + dq:qd + dq + dq * dq].reshape(bs, dq, dq)
    return head, Hdq, rhs


def lnn_forward(x, params, nr, na, eps=1e-6):
    head, Hdq, rhs = lnn_pallas_parts(x, params, nr, na, eps)
    # TODO(synk): torch's try/except pinv fallback for a singular Hdq_L is not
    # replicated; the tiny batched (dq x dq) solve stays in plain JAX.
    ddq = jnp.linalg.solve(Hdq, rhs[..., None])[..., 0]
    return jnp.concatenate([head, ddq], axis=1).astype(x.dtype)


if __name__ == "__main__":
    # model sizes (non-structured LNN, no control net)
    nr, na = 2, 1                       # num_raw, num_angle
    D = 2 * nr + 3 * na                 # state dim = 7
    qd, dq = nr + 2 * na, nr + na
    H1 = H2 = 32
    bs = 4
    eps = 1e-6

    key = jax.random.PRNGKey(0)
    ks = jax.random.split(key, 7)

    def init(k, shape, fan_in):
        return (jax.random.uniform(k, shape, jnp.float32, -1.0, 1.0)
                / np.sqrt(fan_in)).astype(jnp.float32)

    W1 = init(ks[0], (H1, D), D)
    b1 = init(ks[1], (H1,), D)
    W2 = init(ks[2], (H2, H1), H1)
    b2 = init(ks[3], (H2,), H1)
    w3 = init(ks[4], (H2,), H2)        # final layer -> scalar Lagrangian
    b3 = init(ks[5], (1,), H2)
    params = (W1, b1, W2, b2, w3, b3)

    x = jax.random.normal(ks[6], (bs, D), jnp.float32)

    out = jax.block_until_ready(lnn_forward(x, params, nr, na, eps))
    head_k, Hdq_k, rhs_k = jax.block_until_ready(
        lnn_pallas_parts(x, params, nr, na, eps))

    # ---- pure-JAX autodiff reference for the kernel-produced quantities ----
    def Lfun(xb):
        h1 = jnp.tanh(W1 @ xb + b1)
        h2 = jnp.tanh(W2 @ h1 + b2)
        return jnp.dot(w3, h2) + b3[0]

    g = jax.vmap(jax.grad(Lfun))(x)                       # (bs, D)
    H = jax.vmap(jax.jacfwd(jax.grad(Lfun)))(x)           # (bs, D, D)
    Hs = H[:, qd:, :]
    x1 = x[:, nr:nr + na]
    x2 = x[:, nr + na:qd]
    dLdth = -x2 * g[:, nr:nr + na] + x1 * g[:, nr + na:qd]
    dLdrdth = jnp.concatenate([g[:, :nr], dLdth], axis=1)
    Jth = (-x2[:, None, :] * Hs[:, :, nr:nr + na]
           + x1[:, None, :] * Hs[:, :, nr + na:qd])
    Jrth = jnp.concatenate([Hs[:, :, :nr], Jth], axis=2)
    Hdq_r = Hs[:, :, qd:] + eps * jnp.eye(dq, dtype=jnp.float32)
    rhs_r = dLdrdth - jnp.einsum('bij,bj->bi', Jrth, x[:, qd:])
    dth = x[:, qd + nr:]
    head_r = jnp.concatenate([x[:, qd:qd + nr], -x2 * dth, x1 * dth], axis=1)

    np.testing.assert_allclose(np.asarray(head_k), np.asarray(head_r),
                               rtol=5e-3, atol=5e-4)
    np.testing.assert_allclose(np.asarray(Hdq_k), np.asarray(Hdq_r),
                               rtol=5e-3, atol=5e-4)
    np.testing.assert_allclose(np.asarray(rhs_k), np.asarray(rhs_r),
                               rtol=5e-3, atol=5e-4)
    assert out.shape == (bs, D)
    assert bool(jnp.all(jnp.isfinite(out)))

    print("KERNEL_OK")
</pallas_src>

<mosaic_0001>
module attributes {stable_mosaic.version = 11 : i64} {
  func.func @kernel(%arg0: memref<8x7xf32, #tpu.memory_space<vmem>>, %arg1: memref<32x7xf32, #tpu.memory_space<vmem>>, %arg2: memref<3x32xf32, #tpu.memory_space<vmem>>, %arg3: memref<32x32xf32, #tpu.memory_space<vmem>>, %arg4: memref<1x32xf32, #tpu.memory_space<vmem>>, %arg5: memref<1x32xf32, #tpu.memory_space<vmem>>, %arg6: memref<1x32xf32, #tpu.memory_space<vmem>>, %arg7: memref<3x3xf32, #tpu.memory_space<vmem>>, %arg8: memref<8x128xf32, #tpu.memory_space<vmem>>) attributes {dimension_semantics = [], scalar_prefetch = 0 : i64, scratch_operands = 0 : i64, tpu.core_type = #tpu.core_type<tc>} {
    %c0 = arith.constant 0 : index
    %c0_0 = arith.constant 0 : index
    %0 = vector.load %arg0[%c0, %c0_0] : memref<8x7xf32, #tpu.memory_space<vmem>>, vector<8x7xf32>
    %c0_1 = arith.constant 0 : index
    %c0_2 = arith.constant 0 : index
    %1 = vector.load %arg1[%c0_1, %c0_2] : memref<32x7xf32, #tpu.memory_space<vmem>>, vector<32x7xf32>
    %c0_3 = arith.constant 0 : index
    %c0_4 = arith.constant 0 : index
    %2 = vector.load %arg2[%c0_3, %c0_4] : memref<3x32xf32, #tpu.memory_space<vmem>>, vector<3x32xf32>
    %c0_5 = arith.constant 0 : index
    %c0_6 = arith.constant 0 : index
    %3 = vector.load %arg3[%c0_5, %c0_6] : memref<32x32xf32, #tpu.memory_space<vmem>>, vector<32x32xf32>
    %c0_7 = arith.constant 0 : index
    %c0_8 = arith.constant 0 : index
    %4 = vector.load %arg4[%c0_7, %c0_8] : memref<1x32xf32, #tpu.memory_space<vmem>>, vector<1x32xf32>
    %c0_9 = arith.constant 0 : index
    %c0_10 = arith.constant 0 : index
    %5 = vector.load %arg5[%c0_9, %c0_10] : memref<1x32xf32, #tpu.memory_space<vmem>>, vector<1x32xf32>
    %c0_11 = arith.constant 0 : index
    %c0_12 = arith.constant 0 : index
    %6 = vector.load %arg6[%c0_11, %c0_12] : memref<1x32xf32, #tpu.memory_space<vmem>>, vector<1x32xf32>
    %c0_13 = arith.constant 0 : index
    %c0_14 = arith.constant 0 : index
    %7 = vector.load %arg7[%c0_13, %c0_14] : memref<3x3xf32, #tpu.memory_space<vmem>>, vector<3x3xf32>
    %cst = arith.constant dense<0.000000e+00> : vector<8x32xf32>
    %8 = tpu.matmul %0, %1, %cst {dimension_numbers = #tpu.dot_dimension_numbers<[1], [1], [0], [0], [0, 0, 1, 0], [], []>} : vector<8x7xf32>, vector<32x7xf32>, vector<8x32xf32> -> vector<8x32xf32>
    %9 = vector.broadcast %5 : vector<1x32xf32> to vector<8x32xf32>
    %10 = arith.addf %8, %9 : vector<8x32xf32>
    %11 = math.tanh %10 : vector<8x32xf32>
    %12 = arith.mulf %11, %11 : vector<8x32xf32>
    %cst_15 = arith.constant 1.000000e+00 : f32
    %13 = vector.broadcast %cst_15 : f32 to vector<8x32xf32>
    %14 = arith.subf %13, %12 : vector<8x32xf32>
    %cst_16 = arith.constant dense<0.000000e+00> : vector<8x32xf32>
    %15 = tpu.matmul %11, %3, %cst_16 {dimension_numbers = #tpu.dot_dimension_numbers<[1], [1], [0], [0], [0, 0, 1, 0], [], []>} : vector<8x32xf32>, vector<32x32xf32>, vector<8x32xf32> -> vector<8x32xf32>
    %16 = vector.broadcast %6 : vector<1x32xf32> to vector<8x32xf32>
    %17 = arith.addf %15, %16 : vector<8x32xf32>
    %18 = math.tanh %17 : vector<8x32xf32>
    %19 = arith.mulf %18, %18 : vector<8x32xf32>
    %cst_17 = arith.constant 1.000000e+00 : f32
    %20 = vector.broadcast %cst_17 : f32 to vector<8x32xf32>
    %21 = arith.subf %20, %19 : vector<8x32xf32>
    %22 = vector.broadcast %4 : vector<1x32xf32> to vector<8x32xf32>
    %23 = arith.mulf %21, %22 : vector<8x32xf32>
    %cst_18 = arith.constant dense<0.000000e+00> : vector<8x32xf32>
    %24 = tpu.matmul %23, %3, %cst_18 {dimension_numbers = #tpu.dot_dimension_numbers<[1], [0], [0], [1], [0, 0, 1, 1], [], []>} : vector<8x32xf32>, vector<32x32xf32>, vector<8x32xf32> -> vector<8x32xf32>
    %25 = arith.mulf %14, %24 : vector<8x32xf32>
    %cst_19 = arith.constant dense<0.000000e+00> : vector<8x7xf32>
    %26 = tpu.matmul %25, %1, %cst_19 {dimension_numbers = #tpu.dot_dimension_numbers<[1], [0], [0], [1], [0, 0, 1, 1], [], []>} : vector<8x32xf32>, vector<32x7xf32>, vector<8x7xf32> -> vector<8x7xf32>
    %cst_20 = arith.constant -2.000000e+00 : f32
    %27 = vector.broadcast %cst_20 : f32 to vector<8x32xf32>
    %28 = arith.mulf %27, %11 : vector<8x32xf32>
    %29 = arith.mulf %28, %25 : vector<8x32xf32>
    %cst_21 = arith.constant -2.000000e+00 : f32
    %30 = vector.broadcast %cst_21 : f32 to vector<8x32xf32>
    %31 = arith.mulf %30, %18 : vector<8x32xf32>
    %32 = arith.mulf %31, %23 : vector<8x32xf32>
    %33 = vector.extract_strided_slice %0 {offsets = [0, 2], sizes = [8, 1], strides = [1, 1]} : vector<8x7xf32> to vector<8x1xf32>
    %34 = vector.extract_strided_slice %0 {offsets = [0, 3], sizes = [8, 1], strides = [1, 1]} : vector<8x7xf32> to vector<8x1xf32>
    %35 = vector.extract_strided_slice %0 {offsets = [0, 4], sizes = [8, 2], strides = [1, 1]} : vector<8x7xf32> to vector<8x2xf32>
    %36 = vector.extract_strided_slice %0 {offsets = [0, 6], sizes = [8, 1], strides = [1, 1]} : vector<8x7xf32> to vector<8x1xf32>
    %cst_22 = arith.constant 0.000000e+00 : f32
    %37 = vector.broadcast %cst_22 : f32 to vector<8x1xf32>
    %38 = arith.subf %37, %34 : vector<8x1xf32>
    %39 = arith.mulf %38, %36 : vector<8x1xf32>
    %40 = arith.mulf %33, %36 : vector<8x1xf32>
    %41 = tpu.concatenate %35, %39, %40 in 1 : vector<8x2xf32>, vector<8x1xf32>, vector<8x1xf32> -> vector<8x4xf32>
    %cst_23 = arith.constant 0.000000e+00 : f32
    %42 = vector.broadcast %cst_23 : f32 to vector<8x1xf32>
    %43 = arith.subf %42, %34 : vector<8x1xf32>
    %44 = vector.extract_strided_slice %26 {offsets = [0, 2], sizes = [8, 1], strides = [1, 1]} : vector<8x7xf32> to vector<8x1xf32>
    %45 = arith.mulf %43, %44 : vector<8x1xf32>
    %46 = vector.extract_strided_slice %26 {offsets = [0, 3], sizes = [8, 1], strides = [1, 1]} : vector<8x7xf32> to vector<8x1xf32>
    %47 = arith.mulf %33, %46 : vector<8x1xf32>
    %48 = arith.addf %45, %47 : vector<8x1xf32>
    %49 = vector.extract_strided_slice %26 {offsets = [0, 0], sizes = [8, 2], strides = [1, 1]} : vector<8x7xf32> to vector<8x2xf32>
    %50 = tpu.concatenate %49, %48 in 1 : vector<8x2xf32>, vector<8x1xf32> -> vector<8x3xf32>
    %51 = vector.extract_strided_slice %2 {offsets = [0, 0], sizes = [1, 32], strides = [1, 1]} : vector<3x32xf32> to vector<1x32xf32>
    %52 = vector.broadcast %51 : vector<1x32xf32> to vector<8x32xf32>
    %53 = arith.mulf %29, %52 : vector<8x32xf32>
    %54 = vector.broadcast %51 : vector<1x32xf32> to vector<8x32xf32>
    %55 = arith.mulf %14, %54 : vector<8x32xf32>
    %cst_24 = arith.constant dense<0.000000e+00> : vector<8x32xf32>
    %56 = tpu.matmul %55, %3, %cst_24 {dimension_numbers = #tpu.dot_dimension_numbers<[1], [1], [0], [0], [0, 0, 1, 0], [], []>} : vector<8x32xf32>, vector<32x32xf32>, vector<8x32xf32> -> vector<8x32xf32>
    %57 = arith.mulf %56, %32 : vector<8x32xf32>
    %cst_25 = arith.constant dense<0.000000e+00> : vector<8x32xf32>
    %58 = tpu.matmul %57, %3, %cst_25 {dimension_numbers = #tpu.dot_dimension_numbers<[1], [0], [0], [1], [0, 0, 1, 1], [], []>} : vector<8x32xf32>, vector<32x32xf32>, vector<8x32xf32> -> vector<8x32xf32>
    %59 = arith.mulf %58, %14 : vector<8x32xf32>
    %60 = arith.addf %53, %59 : vector<8x32xf32>
    %cst_26 = arith.constant dense<0.000000e+00> : vector<8x7xf32>
    %61 = tpu.matmul %60, %1, %cst_26 {dimension_numbers = #tpu.dot_dimension_numbers<[1], [0], [0], [1], [0, 0, 1, 1], [], []>} : vector<8x32xf32>, vector<32x7xf32>, vector<8x7xf32> -> vector<8x7xf32>
    %62 = vector.extract_strided_slice %61 {offsets = [0, 4], sizes = [8, 3], strides = [1, 1]} : vector<8x7xf32> to vector<8x3xf32>
    %63 = vector.extract_strided_slice %7 {offsets = [0, 0], sizes = [1, 3], strides = [1, 1]} : vector<3x3xf32> to vector<1x3xf32>
    %64 = vector.broadcast %63 : vector<1x3xf32> to vector<8x3xf32>
    %65 = arith.addf %62, %64 : vector<8x3xf32>
    %66 = vector.extract_strided_slice %61 {offsets = [0, 0], sizes = [8, 4], strides = [1, 1]} : vector<8x7xf32> to vector<8x4xf32>
    %67 = arith.mulf %66, %41 : vector<8x4xf32>
    %cst_27 = arith.constant dense<0.000000e+00> : vector<8xf32>
    %68 = vector.multi_reduction <add>, %67, %cst_27 [1] : vector<8x4xf32> to vector<8xf32>
    %69 = vector.shape_cast %68 : vector<8xf32> to vector<8x1xf32>
    %70 = vector.extract_strided_slice %50 {offsets = [0, 0], sizes = [8, 1], strides = [1, 1]} : vector<8x3xf32> to vector<8x1xf32>
    %71 = arith.subf %70, %69 : vector<8x1xf32>
    %72 = vector.extract_strided_slice %2 {offsets = [1, 0], sizes = [1, 32], strides = [1, 1]} : vector<3x32xf32> to vector<1x32xf32>
    %73 = vector.broadcast %72 : vector<1x32xf32> to vector<8x32xf32>
    %74 = arith.mulf %29, %73 : vector<8x32xf32>
    %75 = vector.broadcast %72 : vector<1x32xf32> to vector<8x32xf32>
    %76 = arith.mulf %14, %75 : vector<8x32xf32>
    %cst_28 = arith.constant dense<0.000000e+00> : vector<8x32xf32>
    %77 = tpu.matmul %76, %3, %cst_28 {dimension_numbers = #tpu.dot_dimension_numbers<[1], [1], [0], [0], [0, 0, 1, 0], [], []>} : vector<8x32xf32>, vector<32x32xf32>, vector<8x32xf32> -> vector<8x32xf32>
    %78 = arith.mulf %77, %32 : vector<8x32xf32>
    %cst_29 = arith.constant dense<0.000000e+00> : vector<8x32xf32>
    %79 = tpu.matmul %78, %3, %cst_29 {dimension_numbers = #tpu.dot_dimension_numbers<[1], [0], [0], [1], [0, 0, 1, 1], [], []>} : vector<8x32xf32>, vector<32x32xf32>, vector<8x32xf32> -> vector<8x32xf32>
    %80 = arith.mulf %79, %14 : vector<8x32xf32>
    %81 = arith.addf %74, %80 : vector<8x32xf32>
    %cst_30 = arith.constant dense<0.000000e+00> : vector<8x7xf32>
    %82 = tpu.matmul %81, %1, %cst_30 {dimension_numbers = #tpu.dot_dimension_numbers<[1], [0], [0], [1], [0, 0, 1, 1], [], []>} : vector<8x32xf32>, vector<32x7xf32>, vector<8x7xf32> -> vector<8x7xf32>
    %83 = vector.extract_strided_slice %82 {offsets = [0, 4], sizes = [8, 3], strides = [1, 1]} : vector<8x7xf32> to vector<8x3xf32>
    %84 = vector.extract_strided_slice %7 {offsets = [1, 0], sizes = [1, 3], strides = [1, 1]} : vector<3x3xf32> to vector<1x3xf32>
    %85 = vector.broadcast %84 : vector<1x3xf32> to vector<8x3xf32>
    %86 = arith.addf %83, %85 : vector<8x3xf32>
    %87 = vector.extract_strided_slice %82 {offsets = [0, 0], sizes = [8, 4], strides = [1, 1]} : vector<8x7xf32> to vector<8x4xf32>
    %88 = arith.mulf %87, %41 : vector<8x4xf32>
    %cst_31 = arith.constant dense<0.000000e+00> : vector<8xf32>
    %89 = vector.multi_reduction <add>, %88, %cst_31 [1] : vector<8x4xf32> to vector<8xf32>
    %90 = vector.shape_cast %89 : vector<8xf32> to vector<8x1xf32>
    %91 = vector.extract_strided_slice %50 {offsets = [0, 1], sizes = [8, 1], strides = [1, 1]} : vector<8x3xf32> to vector<8x1xf32>
    %92 = arith.subf %91, %90 : vector<8x1xf32>
    %93 = vector.extract_strided_slice %2 {offsets = [2, 0], sizes = [1, 32], strides = [1, 1]} : vector<3x32xf32> to vector<1x32xf32>
    %94 = vector.broadcast %93 : vector<1x32xf32> to vector<8x32xf32>
    %95 = arith.mulf %29, %94 : vector<8x32xf32>
    %96 = vector.broadcast %93 : vector<1x32xf32> to vector<8x32xf32>
    %97 = arith.mulf %14, %96 : vector<8x32xf32>
    %cst_32 = arith.constant dense<0.000000e+00> : vector<8x32xf32>
    %98 = tpu.matmul %97, %3, %cst_32 {dimension_numbers = #tpu.dot_dimension_numbers<[1], [1], [0], [0], [0, 0, 1, 0], [], []>} : vector<8x32xf32>, vector<32x32xf32>, vector<8x32xf32> -> vector<8x32xf32>
    %99 = arith.mulf %98, %32 : vector<8x32xf32>
    %cst_33 = arith.constant dense<0.000000e+00> : vector<8x32xf32>
    %100 = tpu.matmul %99, %3, %cst_33 {dimension_numbers = #tpu.dot_dimension_numbers<[1], [0], [0], [1], [0, 0, 1, 1], [], []>} : vector<8x32xf32>, vector<32x32xf32>, vector<8x32xf32> -> vector<8x32xf32>
    %101 = arith.mulf %100, %14 : vector<8x32xf32>
    %102 = arith.addf %95, %101 : vector<8x32xf32>
    %cst_34 = arith.constant dense<0.000000e+00> : vector<8x7xf32>
    %103 = tpu.matmul %102, %1, %cst_34 {dimension_numbers = #tpu.dot_dimension_numbers<[1], [0], [0], [1], [0, 0, 1, 1], [], []>} : vector<8x32xf32>, vector<32x7xf32>, vector<8x7xf32> -> vector<8x7xf32>
    %104 = vector.extract_strided_slice %103 {offsets = [0, 4], sizes = [8, 3], strides = [1, 1]} : vector<8x7xf32> to vector<8x3xf32>
    %105 = vector.extract_strided_slice %7 {offsets = [2, 0], sizes = [1, 3], strides = [1, 1]} : vector<3x3xf32> to vector<1x3xf32>
    %106 = vector.broadcast %105 : vector<1x3xf32> to vector<8x3xf32>
    %107 = arith.addf %104, %106 : vector<8x3xf32>
    %108 = vector.extract_strided_slice %103 {offsets = [0, 0], sizes = [8, 4], strides = [1, 1]} : vector<8x7xf32> to vector<8x4xf32>
    %109 = arith.mulf %108, %41 : vector<8x4xf32>
    %cst_35 = arith.constant dense<0.000000e+00> : vector<8xf32>
    %110 = vector.multi_reduction <add>, %109, %cst_35 [1] : vector<8x4xf32> to vector<8xf32>
    %111 = vector.shape_cast %110 : vector<8xf32> to vector<8x1xf32>
    %112 = vector.extract_strided_slice %50 {offsets = [0, 2], sizes = [8, 1], strides = [1, 1]} : vector<8x3xf32> to vector<8x1xf32>
    %113 = arith.subf %112, %111 : vector<8x1xf32>
    %114 = tpu.concatenate %71, %92, %113 in 1 : vector<8x1xf32>, vector<8x1xf32>, vector<8x1xf32> -> vector<8x3xf32>
    %115 = tpu.concatenate %65, %86, %107 in 1 : vector<8x3xf32>, vector<8x3xf32>, vector<8x3xf32> -> vector<8x9xf32>
    %cst_36 = arith.constant 0.000000e+00 : f32
    %116 = vector.broadcast %cst_36 : f32 to vector<8x112xf32>
    %117 = tpu.concatenate %41, %114, %115, %116 in 1 : vector<8x4xf32>, vector<8x3xf32>, vector<8x9xf32>, vector<8x112xf32> -> vector<8x128xf32>
    %c0_37 = arith.constant 0 : index
    %c0_38 = arith.constant 0 : index
    %118 = vector.load %arg8[%c0_37, %c0_38] : memref<8x128xf32, #tpu.memory_space<vmem>>, vector<8x128xf32>
    tpu.vector_store %arg8[%c0_37, %c0_38], %117 {strides = array<i32>} : memref<8x128xf32, #tpu.memory_space<vmem>>, vector<8x128xf32>,
    return
  }
}

</mosaic_0001>

<bundles_post_ra>
// kernel: tpu_custom_call.1
= control target key start
LH: loop header
LB: loop body
LE: loop exit
PB: predicated region body
PF: predicated region fallthrough
CT: control target
= control target key end

     0   :  { %vm50_vm0 = vcmask 56320   ;;  %v1575_v2 = vmov 0.0|0.0   ;;  %vm145_vm2 = vcmask 261120   ;;  %vm1576_vm3 = vmmov 0   ;;  %s1896_s0 = inlined_call_operand.vmem [shape: f32[8,7], index: 0, kind: input, shape index: {}]   ;;  %s1897_s1 = inlined_call_operand.vmem [shape: f32[32,7], index: 1, kind: input, shape index: {}]   ;;  %s1898_s2 = inlined_call_operand.vmem [shape: f32[3,32], index: 2, kind: input, shape index: {}]   ;;  %s1899_s3 = inlined_call_operand.vmem [shape: f32[32,32], index: 3, kind: input, shape index: {}]   ;;  %s1900_s4 = inlined_call_operand.vmem [shape: f32[1,32], index: 4, kind: input, shape index: {}]   ;;  %s1901_s5 = inlined_call_operand.vmem [shape: f32[1,32], index: 5, kind: input, shape index: {}]   ;;  %s1902_s6 = inlined_call_operand.vmem [shape: f32[1,32], index: 6, kind: input, shape index: {}]   ;;  %s1903_s7 = inlined_call_operand.vmem [shape: f32[3,3], index: 7, kind: input, shape index: {}]   ;;  %s1904_s8 = inlined_call_operand.hbm [shape: f32[8,128], index: 8, kind: output, shape index: {}]  }
   0x1   :  { %v31_v0 = vld [vmem:[%s1897_s1] sm:$0xff]  ;;  %v32_v1 = vld [vmem:[%s1897_s1 + $0x8] sm:$0xff]  ;;  %1448 = vmatprep.subr.bf16.mxu0 %v1575_v2  ;;  %vm1642_vm1 = vmpackc.low %vm50_vm0, %vm50_vm0  ;;  %1456 = vmatprep.subr.bf16.mxu1 %v1575_v2  ;;  %v1577_v5 = vmov 0.0  }
   0x2   :  { %v1638_v3 = vpack.c.bf16 %v32_v1, %v31_v0  ;;  %1313 = vmatprep.mubr.msk.f32.mxu0 %vm1576_vm3, %v1577_v5  ;;  %v36_v6 = vld [vmem:[%s1899_s3] sm:$0xff]  ;;  %v37_v7 = vld [vmem:[%s1899_s3 + $0x8] sm:$0xff]  ;;  %vm1657_vm4 = vmpackc.low %vm145_vm2, %vm145_vm2  ;;  %1324 = vmatprep.mubr.msk.f32.mxu1 %vm1576_vm3, %v1577_v5 }
   0x3   :  { %v1666_v9 = vpack.c.bf16 %v37_v7, %v36_v6 }
   0x4   :  { %1451 = vmatpush3.bf16.xpose.msk.msra.mxu0 %vm1642_vm1, %v1638_v3 }
   0x5   :  { %13 = vsyncpa [#allocation3], 0  ;;  %1452 = vmatprep.subr.bf16.mxu0 %v1575_v2  ;;  %v33_v10 = vld [vmem:[%s1897_s1 + $0x10] sm:$0xff]  ;;  %v34_v11 = vld [vmem:[%s1897_s1 + $0x18] sm:$0xff]  ;;  %1459 = vmatpush3.bf16.xpose.msk.msra.mxu1 %vm1657_vm4, %v1666_v9  ;;  %v432_v31 = vlaneseq  ;;  %s1579_s25 = smov 124   ;;  %s1580_s28 = smov 1  }
   0x6   :  { %1460 = vmatprep.subr.bf16.mxu1 %v1575_v2  ;;  %v1679_v12 = vpack.c.bf16 %v34_v11, %v33_v10  ;;  %v1688_v13 = vld [vmem:[%s1896_s0] sm:$0xff]  ;;  %v38_v14 = vld [vmem:[%s1899_s3 + $0x10] sm:$0xff]  ;;  %v39_v15 = vld [vmem:[%s1899_s3 + $0x18] sm:$0xff]  ;;  %s1581_s29 = smov 4   ;;  %s1582_s30 = smov 127   ;;  %vm409_vm5 = vcmask 15360  }
   0x7   :  { %v1702_v16 = vpack.c.bf16 %v39_v15, %v38_v14  ;;  %v1204_v17 = vld [vmem:[%s1901_s5] ss:$0 sm:$0xff]  ;;  %v1733_v34 = vshrl.u32 %v432_v31, 7  ;;  %v392_v4 = vsub.f32 0.0, %v1688_v13  ;;  %vm411_vm6 = vcmask 23552   ;;  %s1584_s9 = smov 7  }
   0x8   :  { %v1210_v22 = vld [vmem:[%s1902_s6] ss:$0 sm:$0xff]  ;;  %vm670_vm7 = vcmask 31744   ;;  %vm1159_vm8 = vcmask 7168   ;;  %vm1175_vm9 = vcmask 48128   ;;  %s1585_s10 = smov [#allocation2]  }
   0x9   :  { %v1216_v28 = vld [vmem:[%s1900_s4] ss:$0 sm:$0xff]  ;;  %v434_v36 = vsub.s32 0, %v1733_v34  ;;  %v677_v41 = vsub.s32 1, %v1733_v34  ;;  %v919_v44 = vsub.s32 2, %v1733_v34  ;;  %s1196_s11 = sshll.u32 %s1585_s10, 4  ;;  %s1197_s11 = int_to_ptr.vmem [resolvable:$true] %s1196_s11 }
   0xa   :  { %v35_v37 = vld [vmem:[%s1898_s2] sm:$0x7]  ;;  %s1578_s2 = smov 125   ;;  %vm1187_vm10 = vcmask 130048   ;;  %s1551_s12 = scalar_lea.vmem %s1197_s11, 128 }
   0xb   :  { %v1746_v39 = vrot.slane %v35_v37, %v434_v36  ;;  %v1762_v42 = vrot.slane %v35_v37, %v677_v41  ;;  %v1778_v45 = vrot.slane %v35_v37, %v919_v44  ;;  %393 = vrot.lane.b32.xlu0 %v1688_v13, %s1578_s2  ;;  %v43_v63 = vld [vmem:[%s1903_s7] sm:$0x7]  ;;  %s1583_s7 = smov 2   ;;  %p1552_p0 = scmp.ne.s32.totalorder %s1197_s11, %s1551_s12 }
   0xc   :  { %1455 = vmatpush3.bf16.xpose.msk.msra.mxu0 %vm1642_vm1, %v1679_v12  ;;  %v906_v1 = vrot.slane %v43_v63, %v677_v41  ;;  %v663_v10 = vrot.slane %v43_v63, %v434_v36  ;;  %v1148_v11 = vrot.slane %v43_v63, %v919_v44  ;;  %p1556_p1 = scmp.lt.s32.totalorder %s1197_s11, %s1197_s11  ;;  %p1557_p2 = scmp.lt.s32.totalorder %s1551_s12, %s1551_s12 }
   0xd   :  { %1464 = vmatprep.subr.bf16.mxu0 %v1575_v2  ;;  %1463 = vmatpush3.bf16.xpose.msk.msra.mxu1 %vm1657_vm4, %v1702_v16 }
   0xe   :  { %1470 = vmatprep.subr.bf16.mxu1 %v1575_v2  ;;  %p1558_p3 = por %p1557_p2, %p1556_p1 }
   0xf   :  { %397 = vrot.lane.b32.xlu0 %v1688_v13, %s1579_s25 }
  0x10   :  { %p1559_p4 = pnand %p1558_p3, %p1552_p0 }
  0x13   :  { %1314 = vmatmul.mubr.msk.f32.vlgmr.msra.gmra.mrb[0].mxu0 %vm50_vm0, %v1688_v13 }
  0x14   :  { %1466 = vmatpush3.bf16.msra.mxu0 %v1666_v9  ;;  %1335 = vmatprep.mubr.msk.f32.mxu0 %vm1576_vm3, %v1577_v5 }
  0x15   :  { %1467 = vmatprep.subr.bf16.mxu0 %v1575_v2 }
  0x18   :  { %1469 = vmatpush3.bf16.msra.mxu0 %v1702_v16 }
  0x19   :  { %1476 = vmatprep.subr.bf16.mxu0 %v1575_v2 }
  0x7d   :  { %v394_v61 = vpop.permute.xlu0 %393 }
  0x7e   :  { %v396_v8 = vmul.f32 %v394_v61, %v392_v4 }
  0x81   :  { %v398_v62 = vpop.permute.xlu0 %397 }
  0x82   :  { %v400_v0 = vmul.f32 %v398_v62, %v1688_v13 }
  0x84   :  { %406 = vrot.lane.b32.xlu0 %v400_v0, %s1580_s28 }
  0x88   :  { %908 = vrot.lane.b32.xlu0 %v906_v1, %s1581_s29 }
  0xe6   :  { %v132_v18 = vpop.f32.mrb[0].mxu0 }
  0xe7   :  { %v133_v19 = vadd.f32 %v1204_v17, %v132_v18  ;;  %v1315_v20 = vpop.f32.mrb[1].mxu0 }
  0xe9   :  { %1547 = vtanh.f32 %v133_v19 }
  0xf3   :  { %v1548_v21 = vpop.eup %1547 }
  0xf4   :  { %1325 = vmatmul.mubr.msk.f32.vlgmr.msra.gmra.mrb[0].mxu1 %vm145_vm2, %v1548_v21  ;;  %v137_v35 = vmul.f32 %v1548_v21, %v1548_v21  ;;  %v388_v49 = vmul.f32 -2.0, %v1548_v21 }
  0xf5   :  { %1472 = vmatpush3.bf16.msra.mxu1 %v1638_v3  ;;  %1346 = vmatprep.mubr.msk.f32.mxu1 %vm1576_vm3, %v1577_v5 }
  0xf6   :  { %1473 = vmatprep.subr.bf16.mxu1 %v1575_v2  ;;  %v1742_v38 = vsub.f32 1.0, %v137_v35 }
  0xf8   :  { %v437_v40 = vmul.f32 %v1746_v39, %v1742_v38  ;;  %v680_v43 = vmul.f32 %v1762_v42, %v1742_v38  ;;  %v922_v46 = vmul.f32 %v1778_v45, %v1742_v38 }
  0xf9   :  { %1475 = vmatpush3.bf16.msra.mxu1 %v1679_v12 }
  0xfa   :  { %1484 = vmatprep.subr.bf16.mxu1 %v1575_v2 }
 0x1c7   :  { %v227_v23 = vpop.f32.mrb[0].mxu1 }
 0x1c8   :  { %v228_v24 = vadd.f32 %v1210_v22, %v227_v23  ;;  %v1326_v25 = vpop.f32.mrb[1].mxu1 }
 0x1c9   :  { %v407_v25 = vpop.permute.xlu0 %406 }
 0x1ca   :  { %1549 = vtanh.f32 %v228_v24 }
 0x1cd   :  { %v909_v37 = vpop.permute.xlu0 %908 }
 0x1d4   :  { %v1550_v26 = vpop.eup %1549 }
 0x1d5   :  { %v232_v27 = vmul.f32 %v1550_v26, %v1550_v26  ;;  %v390_v32 = vmul.f32 -2.0, %v1550_v26 }
 0x1d7   :  { %v233_v29 = vsub.f32 1.0, %v232_v27 }
 0x1d9   :  { %v240_v30 = vmul.f32 %v1216_v28, %v233_v29 }
 0x1db   :  { %1336 = vmatmul.mubr.msk.f32.vlgmr.msra.gmra.mrb[2].mxu0 %vm145_vm2, %v240_v30  ;;  %v391_v33 = vmul.f32 %v390_v32, %v240_v30 }
 0x1dc   :  { %1479 = vmatpush3.bf16.xpose.msk.msra.mxu0 %vm1657_vm4, %v1666_v9  ;;  %1357 = vmatprep.mubr.msk.f32.mxu0 %vm1576_vm3, %v1577_v5 }
 0x1dd   :  { %1480 = vmatprep.subr.bf16.mxu0 %v1575_v2 }
 0x1e4   :  { %1483 = vmatpush3.bf16.xpose.msk.msra.mxu0 %vm1657_vm4, %v1702_v16 }
 0x1e5   :  { %1496 = vmatprep.subr.bf16.mxu0 %v1575_v2 }
 0x1eb   :  { %1358 = vmatmul.mubr.msk.f32.vlgmr.msra.gmra.mrb[4].mxu0 %vm145_vm2, %v437_v40 }
 0x1ec   :  { %1499 = vmatpush3.bf16.xpose.msk.msra.mxu0 %vm1657_vm4, %v1666_v9  ;;  %1390 = vmatprep.mubr.msk.f32.mxu0 %vm1576_vm3, %v1577_v5 }
 0x1ed   :  { %1500 = vmatprep.subr.bf16.mxu0 %v1575_v2 }
 0x1f4   :  { %1503 = vmatpush3.bf16.xpose.msk.msra.mxu0 %vm1657_vm4, %v1702_v16 }
 0x1f5   :  { %1516 = vmatprep.subr.bf16.mxu0 %v1575_v2 }
 0x1fb   :  { %1391 = vmatmul.mubr.msk.f32.vlgmr.msra.gmra.mrb[6].mxu0 %vm145_vm2, %v680_v43 }
 0x1fc   :  { %1519 = vmatpush3.bf16.xpose.msk.msra.mxu0 %vm1657_vm4, %v1666_v9  ;;  %1423 = vmatprep.mubr.msk.f32.mxu0 %vm1576_vm3, %v1577_v5 }
 0x1fd   :  { %1520 = vmatprep.subr.bf16.mxu0 %v1575_v2 }
 0x204   :  { %1523 = vmatpush3.bf16.xpose.msk.msra.mxu0 %vm1657_vm4, %v1702_v16 }
 0x20b   :  { %1424 = vmatmul.mubr.msk.f32.vlgmr.msra.gmra.mrb[8].mxu0 %vm145_vm2, %v922_v46 }
 0x2ae   :  { %v310_v47 = vpop.f32.mrb[2].mxu0 }
 0x2af   :  { %v314_v48 = vmul.f32 %v310_v47, %v1742_v38  ;;  %v1337_v50 = vpop.f32.mrb[3].mxu0 }
 0x2b1   :  { %v1787_v51 = vmul.f32 %v388_v49, %v314_v48  ;;  %1347 = vmatmul.mubr.msk.f32.vlgmr.msra.gmra.mrb[2].mxu1 %vm145_vm2, %v314_v48 }
 0x2b2   :  { %1486 = vmatpush3.bf16.msra.mxu1 %v1666_v9  ;;  %1368 = vmatprep.mubr.msk.f32.mxu1 %vm1576_vm3, %v1577_v5 }
 0x2b3   :  { %1487 = vmatprep.subr.bf16.mxu1 %v1575_v2  ;;  %v436_v15 = vmul.f32 %v1746_v39, %v1787_v51 }
 0x2b6   :  { %1489 = vmatpush3.bf16.msra.mxu1 %v1702_v16 }
 0x2b7   :  { %1490 = vmatprep.subr.bf16.mxu1 %v1575_v2 }
 0x2be   :  { %v507_v52 = vpop.f32.mrb[4].mxu0 }
 0x2bf   :  { %v511_v53 = vmul.f32 %v507_v52, %v391_v33  ;;  %v1359_v54 = vpop.f32.mrb[5].mxu0 }
 0x2c1   :  { %1369 = vmatmul.mubr.msk.f32.vlgmr.msra.gmra.mrb[4].mxu1 %vm145_vm2, %v511_v53 }
 0x2c2   :  { %1492 = vmatpush3.bf16.msra.mxu1 %v1638_v3  ;;  %1379 = vmatprep.mubr.msk.f32.mxu1 %vm1576_vm3, %v1577_v5 }
 0x2c3   :  { %1493 = vmatprep.subr.bf16.mxu1 %v1575_v2 }
 0x2c6   :  { %1495 = vmatpush3.bf16.msra.mxu1 %v1679_v12 }
 0x2c7   :  { %1504 = vmatprep.subr.bf16.mxu1 %v1575_v2 }
 0x2ce   :  { %v750_v55 = vpop.f32.mrb[6].mxu0 }
 0x2cf   :  { %v754_v56 = vmul.f32 %v750_v55, %v391_v33  ;;  %v1392_v57 = vpop.f32.mrb[7].mxu0 }
 0x2de   :  { %v992_v58 = vpop.f32.mrb[8].mxu0 }
 0x2df   :  { %v1803_v59 = vmul.f32 %v992_v58, %v391_v33  ;;  %v1425_v60 = vpop.f32.mrb[9].mxu0  ;;  %v679_v33 = vmul.f32 %v1762_v42, %v1787_v51 }
 0x384   :  { %v1812_v6 = vpop.f32.mrb[2].mxu1 }
 0x385   :  { %418 = vrot.lane.b32.xlu1 %v1812_v6, %s1582_s30  ;;  %v1348_v7 = vpop.f32.mrb[3].mxu1 }
 0x389   :  { %402 = vrot.lane.b32.xlu1 %v396_v8, %s1582_s30 }
 0x38d   :  { %414 = vrot.lane.b32.xlu1 %v1812_v6, %s1580_s28 }
 0x391   :  { %665 = vrot.lane.b32.xlu1 %v663_v10, %s1581_s29 }
 0x394   :  { %v581_v14 = vpop.f32.mrb[4].mxu1 }
 0x395   :  { %v585_v17 = vmul.f32 %v581_v14, %v1742_v38  ;;  %v1370_v18 = vpop.f32.mrb[5].mxu1  ;;  %1150 = vrot.lane.b32.xlu1 %v1148_v11, %s1581_s29 }
 0x397   :  { %v586_v19 = vadd.f32 %v585_v17, %v436_v15 }
 0x399   :  { %1380 = vmatmul.mubr.msk.f32.vlgmr.msra.gmra.mrb[6].mxu1 %vm145_vm2, %v586_v19 }
 0x39a   :  { %1506 = vmatpush3.bf16.msra.mxu1 %v1666_v9  ;;  %1401 = vmatprep.mubr.msk.f32.mxu1 %vm1576_vm3, %v1577_v5 }
 0x39b   :  { %1507 = vmatprep.subr.bf16.mxu1 %v1575_v2 }
 0x39e   :  { %1509 = vmatpush3.bf16.msra.mxu1 %v1702_v16 }
 0x39f   :  { %1510 = vmatprep.subr.bf16.mxu1 %v1575_v2 }
 0x3a1   :  { %1402 = vmatmul.mubr.msk.f32.vlgmr.msra.gmra.mrb[8].mxu1 %vm145_vm2, %v754_v56 }
 0x3a2   :  { %1512 = vmatpush3.bf16.msra.mxu1 %v1638_v3  ;;  %1412 = vmatprep.mubr.msk.f32.mxu1 %vm1576_vm3, %v1577_v5 }
 0x3a3   :  { %1513 = vmatprep.subr.bf16.mxu1 %v1575_v2 }
 0x3a6   :  { %1515 = vmatpush3.bf16.msra.mxu1 %v1679_v12 }
 0x3a7   :  { %1524 = vmatprep.subr.bf16.mxu1 %v1575_v2 }
 0x3f7   :  { %v419_v20 = vpop.permute.xlu1 %418 }
 0x3f8   :  { %v421_v21 = vmul.f32 %v419_v20, %v1688_v13 }
 0x3fa   :  { %423 = vrot.lane.b32.xlu0 %v421_v21, %s1580_s28 }
 0x3fb   :  { %v403_v22 = vpop.permute.xlu1 %402 }
 0x3fc   :  { %v410_v24 = vsel %vm409_vm5, %v398_v62, %v403_v22 }
 0x3fd   :  { %v1844_v26 = vsel %vm411_vm6, %v410_v24, %v407_v25 }
 0x3ff   :  { %v415_v23 = vpop.permute.xlu1 %414 }
 0x400   :  { %v417_v40 = vmul.f32 %v415_v23, %v392_v4 }
 0x403   :  { %v666_v27 = vpop.permute.xlu1 %665 }
 0x407   :  { %v1151_v52 = vpop.permute.xlu1 %1150 }
 0x46c   :  { %v656_v28 = vpop.f32.mrb[6].mxu1  ;;  %v424_v39 = vpop.permute.xlu0 %423 }
 0x46d   :  { %v668_v29 = vadd.f32 %v666_v27, %v656_v28  ;;  %v669_v30 = vmul.f32 %v656_v28, %v1844_v26  ;;  %v1381_v31 = vpop.f32.mrb[7].mxu1 }
 0x46f   :  { %1163 = vrot.lane.b32.xlu1 %v668_v29, %s1579_s25  ;;  %v671_v13 = vsel %vm670_vm7, %v669_v30, 0.0 }
 0x470   :  { %672 = vadd.xlane.f32.xlu0 %v671_v13 }
 0x474   :  { %v824_v32 = vpop.f32.mrb[8].mxu1 }
 0x475   :  { %v828_v34 = vmul.f32 %v824_v32, %v1742_v38  ;;  %v1403_v35 = vpop.f32.mrb[9].mxu1 }
 0x477   :  { %v829_v36 = vadd.f32 %v828_v34, %v679_v33 }
 0x479   :  { %1413 = vmatmul.mubr.msk.f32.vlgmr.msra.gmra.mrb[10].mxu1 %vm145_vm2, %v829_v36 }
 0x47a   :  { %1526 = vmatpush3.bf16.msra.mxu1 %v1666_v9  ;;  %1434 = vmatprep.mubr.msk.f32.mxu1 %vm1576_vm3, %v1577_v5  ;;  %v426_v9 = vadd.f32 %v424_v39, %v417_v40 }
 0x47b   :  { %1527 = vmatprep.subr.bf16.mxu1 %v1575_v2 }
 0x47e   :  { %1529 = vmatpush3.bf16.msra.mxu1 %v1702_v16 }
 0x47f   :  { %1530 = vmatprep.subr.bf16.mxu1 %v1575_v2 }
 0x481   :  { %1435 = vmatmul.mubr.msk.f32.vlgmr.msra.gmra.mrb[12].mxu1 %vm145_vm2, %v1803_v59 }
 0x482   :  { %1532 = vmatpush3.bf16.msra.mxu1 %v1638_v3  ;;  %1445 = vmatprep.mubr.msk.f32.mxu1 %vm1576_vm3, %v1577_v5  ;;  %v921_v3 = vmul.f32 %v1778_v45, %v1787_v51 }
 0x483   :  { %1533 = vmatprep.subr.bf16.mxu1 %v1575_v2 }
 0x486   :  { %428 = vrot.lane.b32.xlu0 %v426_v9, %s1582_s30  ;;  %1535 = vmatpush3.bf16.msra.mxu1 %v1679_v12 }
 0x4fd   :  { %v673_v45 = vpop.xlane.xlu0 %672 }
 0x501   :  { %v429_v51 = vpop.permute.xlu0 %428 }
 0x502   :  { %v431_v55 = vsel %vm409_vm5, %v1812_v6, %v429_v51 }
 0x503   :  { %v674_v57 = vsub.f32 %v431_v55, %v673_v45 }
 0x54c   :  { %v899_v16 = vpop.f32.mrb[10].mxu1 }
 0x54d   :  { %v912_v41 = vmul.f32 %v899_v16, %v1844_v26  ;;  %v1414_v42 = vpop.f32.mrb[11].mxu1  ;;  %v911_v47 = vadd.f32 %v909_v37, %v899_v16 }
 0x54f   :  { %v913_v43 = vsel %vm670_vm7, %v912_v41, 0.0 }
 0x550   :  { %914 = vadd.xlane.f32.xlu1 %v913_v43 }
 0x554   :  { %v1066_v44 = vpop.f32.mrb[12].mxu1 }
 0x555   :  { %v1070_v5 = vmul.f32 %v1066_v44, %v1742_v38  ;;  %v1436_v46 = vpop.f32.mrb[13].mxu1  ;;  %v1164_v38 = vpop.permute.xlu1 %1163 }
 0x557   :  { %v1071_v2 = vadd.f32 %v1070_v5, %v921_v3 }
 0x559   :  { %1446 = vmatmul.mubr.msk.f32.vlgmr.msra.gmra.mrb[14].mxu1 %vm145_vm2, %v1071_v2 }
 0x561   :  { %1167 = vrot.lane.b32.xlu1 %v911_v47, %s1582_s30 }
 0x5dd   :  { %v915_v54 = vpop.xlane.xlu1 %914 }
 0x5de   :  { %v916_v56 = vsub.f32 %v431_v55, %v915_v54 }
 0x5e0   :  { %v1160_v61 = vsel %vm1159_vm8, %v674_v57, %v916_v56 }
 0x5e1   :  { %v1168_v59 = vpop.permute.xlu1 %1167 }
 0x5e2   :  { %v1174_v63 = vsel %vm411_vm6, %v1164_v38, %v1168_v59 }
 0x62c   :  { %v1141_v12 = vpop.f32.mrb[14].mxu1 }
 0x62d   :  { %v1154_v48 = vmul.f32 %v1141_v12, %v1844_v26  ;;  %v1447_v49 = vpop.f32.mrb[15].mxu1  ;;  %v1153_v53 = vadd.f32 %v1151_v52, %v1141_v12 }
 0x62f   :  { %v1155_v50 = vsel %vm670_vm7, %v1154_v48, 0.0 }
 0x630   :  { %1156 = vadd.xlane.f32.xlu0 %v1155_v50 }
 0x646   :  { %1171 = vrot.lane.b32.xlu0 %v1153_v53, %s1583_s7 }
 0x6bd   :  { %v1157_v58 = vpop.xlane.xlu0 %1156 }
 0x6be   :  { %v1158_v60 = vsub.f32 %v431_v55, %v1157_v58 }
 0x6c0   :  { %v1161_v62 = vsel %vm409_vm5, %v1160_v61, %v1158_v60 }
 0x6c1   :  { %1178 = vrot.lane.b32.xlu1 %v1161_v62, %s1581_s29  ;;  %v1172_v0 = vpop.permute.xlu0 %1171 }
 0x6c2   :  { %v1176_v1 = vsel %vm1175_vm9, %v1174_v63, %v1172_v0 }
 0x6c3   :  { %1182 = vrot.lane.b32.xlu0 %v1176_v1, %s1584_s9 }
 0x733   :  { %v1179_v4 = vpop.permute.xlu1 %1178 }
 0x734   :  { %v1185_v6 = vsel %vm670_vm7, %v1844_v26, %v1179_v4 }
 0x735   :  { %v1183_v7 = vpop.permute.xlu0 %1182 }
 0x736   :  { %v1186_v8 = vsel %vm50_vm0, %v1185_v6, %v1183_v7 }
 0x737   :  { %v1188_v10 = vsel %vm1187_vm10, %v1186_v8, 0.0 }
 0x738   :  { %1189 = vst [vmem:[#allocation2] sm:$0xff] %v1188_v10 }
 0x739   :  { %1562 = shalt.err (!%p1559_p4)
}
 0x73a   :  { %s1563_s15 = scalar_lea.hbm %s1904_s8, 128 }
 0x73b   :  { %p1564_p5 = scmp.ne.s32.totalorder %s1904_s8, %s1563_s15  ;;  %p1567_p6 = scmp.lt.u32.totalorder %s1563_s15, %s1904_s8 }
 0x73d   :  { %p1569_p7 = pnand %p1567_p6, %p1564_p5 }
 0x73f   :  { %1572 = shalt.err (!%p1569_p7)
}
 0x740   :  { %1199 = dma.vmem_to_hbm [thread:$0]  %s1197_s11, 128, %s1904_s8, [#allocation3]  }
 0x741   :  { %1573 = dma.done.wait [#allocation3], 128  }
 0x742   :  { %1574 = vsyncadd [#allocation3], 4294967168 }
 0x743   :  { %1203 = vsyncpa [#allocation3], 1 }

</bundles_post_ra>
